<compile_context>
chip_gen: v6e
topology: v6e:2x2x1
jax: 0.10.0
libtpu: 0.0.40
codegen_flags: <defaults>
</compile_context>

<pallas_src>
import functools

import jax
import jax.numpy as jnp
from jax.experimental import pallas as pl
from jax.experimental.pallas import tpu as pltpu


def _round_up(n, m):
    return ((n + m - 1) // m) * m


def _vmem_capacity_bytes():
    """Physical VMEM per core; conservative fallback if the query fails."""
    try:
        info = pltpu.get_tpu_info()
        for attr in ("vmem_capacity_bytes", "vmem_capacity", "vmem_bytes"):
            v = getattr(info, attr, None)
            if v:
                return int(v)
    except Exception:
        pass
    return 64 << 20  # v7x-class conservative default


def _ffn_kernel(x_ref, gamma_ref, beta_ref, w1_ref, b1_ref, w2_ref, b2_ref,
                o_ref, *scratch, eps, acc_in_out):
    # Grid: (row_tiles, f_tiles).  F axis is the last ("arbitrary") reduction
    # axis; the accumulator and xn cache persist across it.
    if acc_in_out:
        (xn_ref,) = scratch
        acc_ref = o_ref          # f32 output block doubles as the accumulator
    else:
        xn_ref, acc_ref = scratch

    j = pl.program_id(1)

    @pl.when(j == 0)
    def _init():
        # LayerNorm stats in f32, computed once per row tile.
        xf = x_ref[...].astype(jnp.float32)
        mean = jnp.mean(xf, axis=-1, keepdims=True)
        var = jnp.mean((xf - mean) ** 2, axis=-1, keepdims=True)
        xn32 = (xf - mean) * jax.lax.rsqrt(var + eps)
        xn32 = (xn32 * gamma_ref[...].astype(jnp.float32)
                + beta_ref[...].astype(jnp.float32))
        # Residual is with the LayerNorm output (matches the PyTorch module).
        # b2 is added exactly once here.
        acc_ref[...] = (xn32 + b2_ref[...].astype(jnp.float32)).astype(acc_ref.dtype)
        # Cache normalized activations in the matmul dtype for the MXU.
        xn_ref[...] = xn32.astype(xn_ref.dtype)

    xn = xn_ref[...]

    # linear1 chunk -> ReLU   (relu_dropout is identity in eval mode)
    h = jnp.dot(xn, w1_ref[...], preferred_element_type=jnp.float32)
    h = jnp.maximum(h + b1_ref[...].astype(jnp.float32), 0.0)

    # Partial linear2 contribution, accumulated in f32.
    # (res_dropout is identity in eval mode)
    acc_ref[...] += jnp.dot(h.astype(w2_ref.dtype), w2_ref[...],
                            preferred_element_type=jnp.float32).astype(acc_ref.dtype)

    if not acc_in_out:
        @pl.when(j == pl.num_programs(1) - 1)
        def _finalize():
            o_ref[...] = acc_ref[...].astype(o_ref.dtype)


def feed_forward_block(x, gamma, beta, w1, b1, w2, b2, *, eps=1e-5,
                       tm=None, tf=None, matmul_dtype=None):
    """x: (B, S, D). Weights: w1 (D, F), b1 (F,), w2 (F, D), b2 (D,)."""
    B, S, D = x.shape
    F = w1.shape[1]
    N = B * S
    x2d = x.reshape(N, D)

    compute_dtype = jnp.dtype(matmul_dtype) if matmul_dtype is not None else x.dtype
    if w1.dtype != compute_dtype:
        w1 = w1.astype(compute_dtype)
        w2 = w2.astype(compute_dtype)

    a_bytes = jnp.dtype(x.dtype).itemsize
    w_bytes = jnp.dtype(compute_dtype).itemsize
    acc_in_out = (x.dtype == jnp.float32)   # f32 output block doubles as acc

    # ---- generation-aware VMEM budget ----
    cap = _vmem_capacity_bytes()
    if cap <= (64 << 20):                       # v7x-class (64 MiB)
        budget = cap - (8 << 20)                # ~56 MiB, leave compiler headroom
    else:                                       # v5e / v6e (128 MiB)
        budget = min(cap - (16 << 20), 100 << 20)

    def ws_bytes(tm_, tf_):
        s = 2 * tm_ * D * a_bytes                       # x tiles (double-buffered)
        s += 2 * tm_ * D * a_bytes                      # out tiles
        s += 2 * 2 * D * tf_ * w_bytes                  # w1 + w2 tiles
        s += 2 * (2 * D * 4 + tf_ * w_bytes + D * w_bytes)   # gamma/beta/b1/b2
        s += tm_ * D * w_bytes                          # xn cache scratch
        if not acc_in_out:
            s += tm_ * D * 4                            # f32 acc scratch
        s += tm_ * tf_ * (4 + w_bytes)                  # f32 h intermediate + cast copy
        s += tm_ * D * 4                                # f32 LayerNorm temporaries
        return s

    # ---- row tile candidates (multiples of 8, MXU-friendly, sized to N) ----
    if tm is not None:
        tm_cands = [tm]
    elif a_bytes <= 2:
        tm_cands = [768, 512, 384, 256, 128]
    else:
        tm_cands = [512, 384, 256, 128]
    max_tm = _round_up(N, 8)
    tm_cands = sorted({min(max(_round_up(t, 8), 8), max_tm) for t in tm_cands},
                      reverse=True)

    # ---- F tile candidates (divisors of F; prefer multiples of 256) ----
    if tf is not None:
        tf_cands = [tf]
    else:
        step = 256 if F % 256 == 0 else (128 if F % 128 == 0 else None)
        if step is None:
            tf_cands = [F]
        else:
            tf_cap = 1024 if cap <= (64 << 20) else 2048
            start = min(F, max((tf_cap // step) * step, step))
            tf_cands = [t for t in range(start, step - 1, -step) if F % t == 0]
            if not tf_cands:
                tf_cands = [F]

    # ---- tile selection ----
    chosen = None
    # 1) full-weight-residency fast path: tf = F, weights DMA'd once total.
    for tm_ in tm_cands:
        if ws_bytes(tm_, F) <= budget:
            chosen = (tm_, F)
            break
    # 2) streamed weights: prioritize large tm (weight-stream arithmetic
    #    intensity ~ 2*tm/w_bytes FLOP/byte), then the largest fitting tf.
    if chosen is None:
        for tm_ in tm_cands:
            for tf_ in tf_cands:
                if ws_bytes(tm_, tf_) <= budget:
                    chosen = (tm_, tf_)
                    break
            if chosen is not None:
                break
    if chosen is None:   # last resort: smallest tiles, let the compiler cope
        chosen = (tm_cands[-1], tf_cands[-1])
    tm_, tf_ = chosen

    grid = (pl.cdiv(N, tm_), F // tf_)

    # ---- VMEM limit: estimated working set + headroom, clamped to budget ----
    ws = ws_bytes(tm_, tf_)
    vmem_limit = min(budget, max(int(ws * 1.4), 48 << 20))
    if ws > vmem_limit:
        vmem_limit = min(int(ws * 1.25), cap - (4 << 20))
    vmem_limit = int(max(vmem_limit, 16 << 20))

    # LN params / biases as (1, dim) for TPU-friendly 2D layout.
    gamma2 = gamma.reshape(1, D)
    beta2 = beta.reshape(1, D)
    b1_2 = b1.reshape(1, F)
    b2_2 = b2.reshape(1, D)

    scratch_shapes = [pltpu.VMEM((tm_, D), compute_dtype)]   # cached LN output
    if not acc_in_out:
        scratch_shapes.append(pltpu.VMEM((tm_, D), jnp.float32))  # f32 accumulator

    kernel = functools.partial(_ffn_kernel, eps=eps, acc_in_out=acc_in_out)

    out2d = pl.pallas_call(
        kernel,
        out_shape=jax.ShapeDtypeStruct((N, D), x.dtype),
        grid_spec=pltpu.PrefetchScalarGridSpec(
            num_scalar_prefetch=0,
            grid=grid,
            in_specs=[
                pl.BlockSpec((tm_, D), lambda i, j: (i, 0)),    # x rows
                pl.BlockSpec((1, D), lambda i, j: (0, 0)),      # gamma
                pl.BlockSpec((1, D), lambda i, j: (0, 0)),      # beta
                pl.BlockSpec((D, tf_), lambda i, j: (0, j)),    # w1 chunk
                pl.BlockSpec((1, tf_), lambda i, j: (0, j)),    # b1 chunk
                pl.BlockSpec((tf_, D), lambda i, j: (j, 0)),    # w2 chunk
                pl.BlockSpec((1, D), lambda i, j: (0, 0)),      # b2
            ],
            out_specs=pl.BlockSpec((tm_, D), lambda i, j: (i, 0)),
            scratch_shapes=scratch_shapes,
        ),
        compiler_params=pltpu.CompilerParams(
            dimension_semantics=("parallel", "arbitrary"),
            vmem_limit_bytes=vmem_limit,
        ),
    )(x2d, gamma2, beta2, w1, b1_2, w2, b2_2)

    return out2d.reshape(B, S, D)


def _reference(x, gamma, beta, w1, b1, w2, b2, eps=1e-5):
    xf = x.astype(jnp.float32)
    mean = jnp.mean(xf, axis=-1, keepdims=True)
    var = jnp.mean((xf - mean) ** 2, axis=-1, keepdims=True)
    xn = (xf - mean) * jax.lax.rsqrt(var + eps) * gamma + beta
    h = jnp.maximum(xn @ w1 + b1, 0.0)
    x2 = h @ w2 + b2
    # PyTorch module rebinds x = layernorm(x) before the residual add.
    return (xn + x2).astype(x.dtype)


if __name__ == "__main__":
    # Small shapes: batch=2, seq=8, d_model=32, dim_feedforward=64
    B, S, D, Fdim = 2, 8, 32, 64
    key = jax.random.PRNGKey(0)
    kx, k1, k2, k3, k4 = jax.random.split(key, 5)

    x = jax.random.normal(kx, (B, S, D), dtype=jnp.float32)

    bound1 = 1.0 / (D ** 0.5)
    bound2 = 1.0 / (Fdim ** 0.5)
    w1 = jax.random.uniform(k1, (D, Fdim), minval=-bound1, maxval=bound1, dtype=jnp.float32)
    b1 = jax.random.uniform(k2, (Fdim,), minval=-bound1, maxval=bound1, dtype=jnp.float32)
    w2 = jax.random.uniform(k3, (Fdim, D), minval=-bound2, maxval=bound2, dtype=jnp.float32)
    b2 = jax.random.uniform(k4, (D,), minval=-bound2, maxval=bound2, dtype=jnp.float32)
    gamma = jnp.ones((D,), dtype=jnp.float32)   # nn.LayerNorm default weight
    beta = jnp.zeros((D,), dtype=jnp.float32)   # nn.LayerNorm default bias

    out = feed_forward_block(x, gamma, beta, w1, b1, w2, b2)
    out = jax.block_until_ready(out)

    ref = _reference(x, gamma, beta, w1, b1, w2, b2)
    assert out.shape == (B, S, D)
    assert jnp.allclose(out, ref, atol=1e-4, rtol=1e-4), "mismatch vs reference"

    print("KERNEL_OK")
</pallas_src>

<mosaic_0001>
module attributes {stable_mosaic.version = 11 : i64} {
  func.func @_ffn_kernel(%arg0: i32, %arg1: i32, %arg2: memref<16x32xf32, #tpu.memory_space<vmem>>, %arg3: memref<1x32xf32, #tpu.memory_space<vmem>>, %arg4: memref<1x32xf32, #tpu.memory_space<vmem>>, %arg5: memref<32x64xf32, #tpu.memory_space<vmem>>, %arg6: memref<1x64xf32, #tpu.memory_space<vmem>>, %arg7: memref<64x32xf32, #tpu.memory_space<vmem>>, %arg8: memref<1x32xf32, #tpu.memory_space<vmem>>, %arg9: memref<16x32xf32, #tpu.memory_space<vmem>>, %arg10: memref<16x32xf32, #tpu.memory_space<vmem>>) attributes {dimension_semantics = [#tpu.dimension_semantics<parallel>, #tpu.dimension_semantics<arbitrary>], iteration_bounds = array<i64: 1, 1>, scalar_prefetch = 0 : i64, scratch_operands = 1 : i64, tpu.core_type = #tpu.core_type<tc>, window_params = [{transform_indices = @transform_0, window_bounds = array<i64: 16, 32>}, {pipeline_mode = #tpu.pipeline_mode<synchronous>, transform_indices = @transform_1, window_bounds = array<i64: 1, 32>}, {pipeline_mode = #tpu.pipeline_mode<synchronous>, transform_indices = @transform_2, window_bounds = array<i64: 1, 32>}, {transform_indices = @transform_3, window_bounds = array<i64: 32, 64>}, {transform_indices = @transform_4, window_bounds = array<i64: 1, 64>}, {transform_indices = @transform_5, window_bounds = array<i64: 64, 32>}, {pipeline_mode = #tpu.pipeline_mode<synchronous>, transform_indices = @transform_6, window_bounds = array<i64: 1, 32>}, {transform_indices = @transform_7, window_bounds = array<i64: 16, 32>}]} {
    %c0_i32 = arith.constant 0 : i32
    %0 = arith.cmpi eq, %arg1, %c0_i32 : i32
    %1 = arith.extui %0 : i1 to i32
    %c0_i32_0 = arith.constant 0 : i32
    %2 = arith.cmpi ne, %1, %c0_i32_0 : i32
    scf.if %2 {
      %c0_14 = arith.constant 0 : index
      %c0_15 = arith.constant 0 : index
      %16 = vector.load %arg2[%c0_14, %c0_15] : memref<16x32xf32, #tpu.memory_space<vmem>>, vector<16x32xf32>
      %cst_16 = arith.constant dense<0.000000e+00> : vector<16xf32>
      %17 = vector.multi_reduction <add>, %16, %cst_16 [1] : vector<16x32xf32> to vector<16xf32>
      %18 = vector.shape_cast %17 : vector<16xf32> to vector<16x1xf32>
      %cst_17 = arith.constant 3.200000e+01 : f32
      %19 = vector.broadcast %cst_17 : f32 to vector<16x1xf32>
      %20 = arith.divf %18, %19 : vector<16x1xf32>
      %21 = vector.broadcast %20 : vector<16x1xf32> to vector<16x32xf32>
      %22 = arith.subf %16, %21 : vector<16x32xf32>
      %23 = arith.mulf %22, %22 : vector<16x32xf32>
      %cst_18 = arith.constant dense<0.000000e+00> : vector<16xf32>
      %24 = vector.multi_reduction <add>, %23, %cst_18 [1] : vector<16x32xf32> to vector<16xf32>
      %25 = vector.shape_cast %24 : vector<16xf32> to vector<16x1xf32>
      %cst_19 = arith.constant 3.200000e+01 : f32
      %26 = vector.broadcast %cst_19 : f32 to vector<16x1xf32>
      %27 = arith.divf %25, %26 : vector<16x1xf32>
      %28 = vector.broadcast %20 : vector<16x1xf32> to vector<16x32xf32>
      %29 = arith.subf %16, %28 : vector<16x32xf32>
      %cst_20 = arith.constant 9.99999974E-6 : f32
      %30 = vector.broadcast %cst_20 : f32 to vector<16x1xf32>
      %31 = arith.addf %27, %30 : vector<16x1xf32>
      %32 = math.rsqrt %31 : vector<16x1xf32>
      %33 = vector.broadcast %32 : vector<16x1xf32> to vector<16x32xf32>
      %34 = arith.mulf %29, %33 : vector<16x32xf32>
      %c0_21 = arith.constant 0 : index
      %c0_22 = arith.constant 0 : index
      %35 = vector.load %arg3[%c0_21, %c0_22] : memref<1x32xf32, #tpu.memory_space<vmem>>, vector<1x32xf32>
      %36 = vector.broadcast %35 : vector<1x32xf32> to vector<16x32xf32>
      %37 = arith.mulf %34, %36 : vector<16x32xf32>
      %c0_23 = arith.constant 0 : index
      %c0_24 = arith.constant 0 : index
      %38 = vector.load %arg4[%c0_23, %c0_24] : memref<1x32xf32, #tpu.memory_space<vmem>>, vector<1x32xf32>
      %39 = vector.broadcast %38 : vector<1x32xf32> to vector<16x32xf32>
      %40 = arith.addf %37, %39 : vector<16x32xf32>
      %c0_25 = arith.constant 0 : index
      %c0_26 = arith.constant 0 : index
      %41 = vector.load %arg8[%c0_25, %c0_26] : memref<1x32xf32, #tpu.memory_space<vmem>>, vector<1x32xf32>
      %42 = vector.broadcast %41 : vector<1x32xf32> to vector<16x32xf32>
      %43 = arith.addf %40, %42 : vector<16x32xf32>
      %c0_27 = arith.constant 0 : index
      %c0_28 = arith.constant 0 : index
      %44 = vector.load %arg9[%c0_27, %c0_28] : memref<16x32xf32, #tpu.memory_space<vmem>>, vector<16x32xf32>
      tpu.vector_store %arg9[%c0_27, %c0_28], %43 {strides = array<i32>} : memref<16x32xf32, #tpu.memory_space<vmem>>, vector<16x32xf32>,
      %c0_29 = arith.constant 0 : index
      %c0_30 = arith.constant 0 : index
      %45 = vector.load %arg10[%c0_29, %c0_30] : memref<16x32xf32, #tpu.memory_space<vmem>>, vector<16x32xf32>
      tpu.vector_store %arg10[%c0_29, %c0_30], %40 {strides = array<i32>} : memref<16x32xf32, #tpu.memory_space<vmem>>, vector<16x32xf32>,
    } else {
    }
    %c0 = arith.constant 0 : index
    %c0_1 = arith.constant 0 : index
    %3 = vector.load %arg10[%c0, %c0_1] : memref<16x32xf32, #tpu.memory_space<vmem>>, vector<16x32xf32>
    %c0_2 = arith.constant 0 : index
    %c0_3 = arith.constant 0 : index
    %4 = vector.load %arg5[%c0_2, %c0_3] : memref<32x64xf32, #tpu.memory_space<vmem>>, vector<32x64xf32>
    %cst = arith.constant dense<0.000000e+00> : vector<16x64xf32>
    %5 = tpu.matmul %3, %4, %cst {dimension_numbers = #tpu.dot_dimension_numbers<[1], [0], [0], [1], [0, 0, 1, 1], [], []>} : vector<16x32xf32>, vector<32x64xf32>, vector<16x64xf32> -> vector<16x64xf32>
    %c0_4 = arith.constant 0 : index
    %c0_5 = arith.constant 0 : index
    %6 = vector.load %arg6[%c0_4, %c0_5] : memref<1x64xf32, #tpu.memory_space<vmem>>, vector<1x64xf32>
    %7 = vector.broadcast %6 : vector<1x64xf32> to vector<16x64xf32>
    %8 = arith.addf %5, %7 : vector<16x64xf32>
    %cst_6 = arith.constant 0.000000e+00 : f32
    %9 = vector.broadcast %cst_6 : f32 to vector<16x64xf32>
    %10 = arith.maximumf %8, %9 : vector<16x64xf32>
    %c0_7 = arith.constant 0 : index
    %c0_8 = arith.constant 0 : index
    %11 = vector.load %arg9[%c0_7, %c0_8] : memref<16x32xf32, #tpu.memory_space<vmem>>, vector<16x32xf32>
    %c0_9 = arith.constant 0 : index
    %c0_10 = arith.constant 0 : index
    %12 = vector.load %arg7[%c0_9, %c0_10] : memref<64x32xf32, #tpu.memory_space<vmem>>, vector<64x32xf32>
    %cst_11 = arith.constant dense<0.000000e+00> : vector<16x32xf32>
    %13 = tpu.matmul %10, %12, %cst_11 {dimension_numbers = #tpu.dot_dimension_numbers<[1], [0], [0], [1], [0, 0, 1, 1], [], []>} : vector<16x64xf32>, vector<64x32xf32>, vector<16x32xf32> -> vector<16x32xf32>
    %14 = arith.addf %11, %13 : vector<16x32xf32>
    %c0_12 = arith.constant 0 : index
    %c0_13 = arith.constant 0 : index
    %15 = vector.load %arg9[%c0_12, %c0_13] : memref<16x32xf32, #tpu.memory_space<vmem>>, vector<16x32xf32>
    tpu.vector_store %arg9[%c0_12, %c0_13], %14 {strides = array<i32>} : memref<16x32xf32, #tpu.memory_space<vmem>>, vector<16x32xf32>,
    return
  }
  func.func @transform_0(%arg0: i32, %arg1: i32) -> (i32, i32) {
    %c0_i32 = arith.constant 0 : i32
    %c0_i32_0 = arith.constant 0 : i32
    return %arg0, %c0_i32 : i32, i32
  }
  func.func @transform_1(%arg0: i32, %arg1: i32) -> (i32, i32) {
    %c0_i32 = arith.constant 0 : i32
    %c0_i32_0 = arith.constant 0 : i32
    %c0_i32_1 = arith.constant 0 : i32
    return %c0_i32, %c0_i32_0 : i32, i32
  }
  func.func @transform_2(%arg0: i32, %arg1: i32) -> (i32, i32) {
    %c0_i32 = arith.constant 0 : i32
    %c0_i32_0 = arith.constant 0 : i32
    %c0_i32_1 = arith.constant 0 : i32
    return %c0_i32, %c0_i32_0 : i32, i32
  }
  func.func @transform_3(%arg0: i32, %arg1: i32) -> (i32, i32) {
    %c0_i32 = arith.constant 0 : i32
    %c0_i32_0 = arith.constant 0 : i32
    return %c0_i32, %arg1 : i32, i32
  }
  func.func @transform_4(%arg0: i32, %arg1: i32) -> (i32, i32) {
    %c0_i32 = arith.constant 0 : i32
    %c0_i32_0 = arith.constant 0 : i32
    return %c0_i32, %arg1 : i32, i32
  }
  func.func @transform_5(%arg0: i32, %arg1: i32) -> (i32, i32) {
    %c0_i32 = arith.constant 0 : i32
    %c0_i32_0 = arith.constant 0 : i32
    return %arg1, %c0_i32 : i32, i32
  }
  func.func @transform_6(%arg0: i32, %arg1: i32) -> (i32, i32) {
    %c0_i32 = arith.constant 0 : i32
    %c0_i32_0 = arith.constant 0 : i32
    %c0_i32_1 = arith.constant 0 : i32
    return %c0_i32, %c0_i32_0 : i32, i32
  }
  func.func @transform_7(%arg0: i32, %arg1: i32) -> (i32, i32) {
    %c0_i32 = arith.constant 0 : i32
    %c0_i32_0 = arith.constant 0 : i32
    return %arg0, %c0_i32 : i32, i32
  }
}

</mosaic_0001>

<bundles_post_ra>
// kernel: tpu_custom_call.1
= control target key start
LH: loop header
LB: loop body
LE: loop exit
PB: predicated region body
PF: predicated region fallthrough
CT: control target
= control target key end

     0   :  { %vm33_vm0 = vcmask 261120   ;;  %s496_s0 = inlined_call_operand.vmem [shape: f32[16,32], index: 0, kind: input, shape index: {}]   ;;  %s497_s1 = inlined_call_operand.vmem [shape: f32[1,32], index: 1, kind: input, shape index: {}]   ;;  %s498_s2 = inlined_call_operand.vmem [shape: f32[1,32], index: 2, kind: input, shape index: {}]   ;;  %s499_s3 = inlined_call_operand.vmem [shape: f32[32,64], index: 3, kind: input, shape index: {}]   ;;  %s500_s4 = inlined_call_operand.vmem [shape: f32[1,64], index: 4, kind: input, shape index: {}]   ;;  %s501_s5 = inlined_call_operand.vmem [shape: f32[64,32], index: 5, kind: input, shape index: {}]   ;;  %s502_s6 = inlined_call_operand.vmem [shape: f32[1,32], index: 6, kind: input, shape index: {}]   ;;  %s503_s7 = inlined_call_operand.hbm [shape: f32[16,32], index: 7, kind: output, shape index: {}]  }
   0x1   :  { %v31_v0 = vld [vmem:[%s496_s0] sm:$0xff]  ;;  %v32_v1 = vld [vmem:[%s496_s0 + $0x8] sm:$0xff] }
   0x2   :  { %12 = vsyncpa [#allocation4], 0  ;;  %v34_v2 = vsel %vm33_vm0, %v31_v0, 0.0  ;;  %v37_v3 = vsel %vm33_vm0, %v32_v1, 0.0  ;;  %v97_v14 = vld [vmem:[%s499_s3 + $0x18] sm:$0xff]  ;;  %v96_v15 = vld [vmem:[%s499_s3 + $0x10] sm:$0xff] }
   0x3   :  { %35 = vadd.xlane.f32.xlu0 %v34_v2  ;;  %325 = vmatprep.subr.mxu0 %v97_v14  ;;  %v95_v16 = vld [vmem:[%s499_s3 + $0x8] sm:$0xff]  ;;  %v94_v17 = vld [vmem:[%s499_s3] sm:$0xff]  ;;  %v198_v18 = vld [vmem:[%s501_s5 + $0x38] sm:$0xff]  ;;  %vm199_vm1 = vcmask 523264   ;;  %s384_s8 = smov [#allocation3]  }
   0x4   :  { %326 = vmatpush3.msra.mxu0 %v97_v14  ;;  %v197_v19 = vld [vmem:[%s501_s5 + $0x30] sm:$0xff]  ;;  %336 = vmatprep.subr.mxu1 %v198_v18  ;;  %v196_v20 = vld [vmem:[%s501_s5 + $0x28] sm:$0xff]  ;;  %v195_v21 = vld [vmem:[%s501_s5 + $0x20] sm:$0xff]  ;;  %s290_s9 = sshll.u32 %s384_s8, 4  ;;  %s291_s9 = int_to_ptr.vmem [resolvable:$true] %s290_s9 }
   0x5   :  { %327 = vmatprep.subr.mxu0 %v96_v15  ;;  %337 = vmatpush3.msra.mxu1 %v198_v18  ;;  %v301_v29 = vld [vmem:[%s497_s1] ss:$0 sm:$0xff]  ;;  %v194_v43 = vld [vmem:[%s501_s5 + $0x18] sm:$0xff]  ;;  %v193_v44 = vld [vmem:[%s501_s5 + $0x10] sm:$0xff]  ;;  %p367_p1 = scmp.lt.s32.totalorder %s291_s9, %s291_s9 }
   0x6   :  { %328 = vmatpush3.msra.mxu0 %v96_v15  ;;  %338 = vmatprep.subr.mxu1 %v197_v19  ;;  %v302_v31 = vld [vmem:[%s498_s2] ss:$0 sm:$0xff]  ;;  %v192_v45 = vld [vmem:[%s501_s5 + $0x8] sm:$0xff] }
   0x7   :  { %38 = vadd.xlane.f32.xlu0 %v37_v3  ;;  %329 = vmatprep.subr.mxu0 %v95_v16  ;;  %v303_v34 = vld [vmem:[%s502_s6] ss:$0 sm:$0xff] }
   0x8   :  { %330 = vmatpush3.msra.mxu0 %v95_v16  ;;  %339 = vmatpush3.msra.mxu1 %v197_v19  ;;  %v191_v46 = vld [vmem:[%s501_s5] sm:$0xff] }
   0x9   :  { %331 = vmatprep.subr.mxu0 %v94_v17  ;;  %340 = vmatprep.subr.mxu1 %v196_v20  ;;  %v304_v47 = vld [vmem:[%s500_s4] ss:$0 sm:$0xff]  ;;  %s362_s4 = scalar_lea.vmem %s291_s9, 256 }
   0xa   :  { %332 = vmatpush3.msra.mxu0 %v94_v17  ;;  %341 = vmatpush3.msra.mxu1 %v196_v20  ;;  %p363_p0 = scmp.ne.s32.totalorder %s291_s9, %s362_s4  ;;  %p368_p2 = scmp.lt.s32.totalorder %s362_s4, %s362_s4 }
   0xb   :  { %342 = vmatprep.subr.mxu1 %v195_v21 }
   0xc   :  { %343 = vmatpush3.msra.mxu1 %v195_v21  ;;  %p369_p3 = por %p368_p2, %p367_p1 }
   0xd   :  { %344 = vmatprep.subr.mxu1 %v194_v43 }
   0xe   :  { %345 = vmatpush3.msra.mxu1 %v194_v43  ;;  %p370_p4 = pnand %p369_p3, %p363_p0 }
   0xf   :  { %346 = vmatprep.subr.mxu1 %v193_v44 }
  0x10   :  { %347 = vmatpush3.msra.mxu1 %v193_v44 }
  0x11   :  { %348 = vmatprep.subr.mxu1 %v192_v45 }
  0x12   :  { %349 = vmatpush3.msra.mxu1 %v192_v45 }
  0x13   :  { %350 = vmatprep.subr.mxu1 %v191_v46 }
  0x14   :  { %351 = vmatpush3.msra.mxu1 %v191_v46 }
  0x8c   :  { %v36_v4 = vpop.xlane.xlu0 %35 }
  0x8d   :  { %v41_v5 = vmul.f32 0.03125, %v36_v4 }
  0x8f   :  { %v43_v6 = vsub.f32 %v31_v0, %v41_v5 }
  0x90   :  { %v39_v7 = vpop.xlane.xlu0 %38 }
  0x91   :  { %v42_v8 = vmul.f32 0.03125, %v39_v7  ;;  %v45_v9 = vmul.f32 %v43_v6, %v43_v6 }
  0x93   :  { %v44_v10 = vsub.f32 %v32_v1, %v42_v8  ;;  %v47_v11 = vsel %vm33_vm0, %v45_v9, 0.0 }
  0x94   :  { %48 = vadd.xlane.f32.xlu1 %v47_v11 }
  0x95   :  { %v46_v12 = vmul.f32 %v44_v10, %v44_v10 }
  0x97   :  { %v50_v13 = vsel %vm33_vm0, %v46_v12, 0.0 }
  0x98   :  { %51 = vadd.xlane.f32.xlu1 %v50_v13 }
 0x11d   :  { %v49_v22 = vpop.xlane.xlu1 %48 }
 0x11e   :  { %v53_v23 = vmul.f32 0.03125, %v49_v22 }
 0x120   :  { %v55_v24 = vadd.f32 1e-05, %v53_v23 }
 0x121   :  { %v52_v25 = vpop.xlane.xlu1 %51 }
 0x122   :  { %358 = vrsqrt.f32 %v55_v24  ;;  %v54_v26 = vmul.f32 0.03125, %v52_v25 }
 0x124   :  { %v56_v27 = vadd.f32 1e-05, %v54_v26 }
 0x126   :  { %360 = vrsqrt.f32 %v56_v27 }
 0x12f   :  { %v359_v28 = vpop.eup %358 }
 0x130   :  { %v59_v30 = vmul.f32 %v359_v28, %v43_v6 }
 0x132   :  { %v68_v32 = vmul.f32 %v301_v29, %v59_v30 }
 0x133   :  { %v361_v33 = vpop.eup %360 }
 0x134   :  { %v77_v35 = vadd.f32 %v302_v31, %v68_v32  ;;  %v60_v36 = vmul.f32 %v361_v33, %v44_v10 }
 0x136   :  { %90 = vst.msk [vmem:[#allocation2] sm:$0xff] %vm33_vm0, %v77_v35  ;;  %v69_v37 = vmul.f32 %v301_v29, %v60_v36  ;;  %v86_v38 = vadd.f32 %v303_v34, %v77_v35 }
 0x138   :  { %v78_v39 = vadd.f32 %v302_v31, %v69_v37  ;;  %88 = vst.msk [vmem:[#allocation3] sm:$0xff] %vm33_vm0, %v86_v38 }
 0x13a   :  { %91 = vst.msk [vmem:[#allocation2 + $0x8] sm:$0xff] %vm33_vm0, %v78_v39  ;;  %v87_v40 = vadd.f32 %v303_v34, %v78_v39 }
 0x13c   :  { %89 = vst.msk [vmem:[#allocation3 + $0x8] sm:$0xff] %vm33_vm0, %v87_v40 }
 0x13d   :  { %v92_v41 = vld [vmem:[#allocation2] sm:$0xff] }
 0x13e   :  { %333 = vmatprep.mubr.msk.f32.mxu0 %vm33_vm0, %v92_v41 }
 0x13f   :  { %v189_v57 = vld [vmem:[#allocation3] sm:$0xff] }
 0x141   :  { %v93_v42 = vld [vmem:[#allocation2 + $0x8] sm:$0xff] }
 0x142   :  { %334 = vmatmul.mubr.msk.f32.vlgmr.msra.gmra.mxu0 %vm33_vm0, %v93_v42 }
 0x143   :  { %v190_v54 = vld [vmem:[#allocation3 + $0x8] sm:$0xff] }
 0x202   :  { %v335_v48 = vpop.f32.mrf.mxu0 }
 0x203   :  { %v184_v49 = vadd.f32 %v335_v48, %v304_v47 }
 0x204   :  { %v178_v50 = vpop.f32.mrf.mxu0 }
 0x205   :  { %v179_v51 = vadd.f32 %v304_v47, %v178_v50  ;;  %v188_v53 = vmax.f32 %v184_v49, 0.0 }
 0x207   :  { %v187_v52 = vmax.f32 %v179_v51, 0.0 }
 0x209   :  { %352 = vmatprep.mubr.msk.f32.mxu1 %vm199_vm1, %v187_v52 }
 0x20a   :  { %353 = vmatmul.mubr.msk.f32.vlgmr.msra.gmra.mxu1 %vm199_vm1, %v188_v53 }
 0x2ca   :  { %v354_v55 = vpop.f32.mrf.mxu1 }
 0x2cb   :  { %v282_v56 = vadd.f32 %v354_v55, %v190_v54 }
 0x2cc   :  { %v272_v58 = vpop.f32.mrf.mxu1 }
 0x2cd   :  { %284 = vst.msk [vmem:[#allocation3 + $0x8] sm:$0xff] %vm33_vm0, %v282_v56  ;;  %v281_v59 = vadd.f32 %v272_v58, %v189_v57 }
 0x2cf   :  { %283 = vst.msk [vmem:[#allocation3] sm:$0xff] %vm33_vm0, %v281_v59 }
 0x2d0   :  { %373 = shalt.err (!%p370_p4)
}
 0x2d1   :  { %s385_s5 = smov 128   ;;  %s386_s10 = smov 8  }
 0x2d2   :  { %296 = dma.vmem_to_hbm [thread:$0]  %s291_s9, 256, %s503_s7, [#allocation4], %s385_s5, %s385_s5, %s386_s10  }
 0x2d3   :  { %382 = dma.done.wait [#allocation4], 256  }
 0x2d4   :  { %383 = vsyncadd [#allocation4], 4294967040 }
 0x2d5   :  { %300 = vsyncpa [#allocation4], 1 }

</bundles_post_ra>
